<compile_context>
chip_gen: v6e
topology: v6e:2x2x1
jax: 0.10.0
libtpu: 0.0.40
codegen_flags: <defaults>
</compile_context>

<pallas_src>
import functools
import string

import jax
import jax.numpy as jnp
from jax import lax
from jax.experimental import pallas as pl
from jax.experimental.pallas import tpu as pltpu

OUT_PAD = 128    # lane-dense padded output width (real output_size sliced host-side)
NEG_BIG = -1e30  # finite "minus infinity" for padded logit lanes (f32 only)


def rnn_seq_kernel(xh_ref,      # (T, H)       pre-gathered i2h input rows  W_ih_x[idx_t]
                   xo_ref,      # (T, OUT_PAD) pre-gathered i2o input rows  W_io_x[idx_t]
                   h0_ref,      # (1, H)       initial hidden
                   wih_h_ref,   # (H, H)       i2h weight, hidden part
                   bih_ref,     # (1, H)       i2h bias
                   wio_h_ref,   # (H, OUT_PAD) i2o weight, hidden part (zero-padded lanes)
                   bio_ref,     # (1, OUT_PAD) i2o bias, -1e30 in padded lanes
                   out_ref,     # (T, OUT_PAD) per-step log-probs
                   hf_ref,      # (1, H)       final hidden state
                   hist_ref):   # (T, H)       VMEM scratch: previous-hidden history
    T = xh_ref.shape[0]

    def step(t, h_prev):
        # Record the hidden the i2o projection of step t uses (h_{t-1}).
        hist_ref[pl.ds(t, 1), :] = h_prev
        # hidden_t = [x_t, h_{t-1}] @ W_i2h^T + b_i2h
        h_new = (xh_ref[pl.ds(t, 1), :]
                 + jnp.dot(h_prev, wih_h_ref[...],
                           preferred_element_type=jnp.float32)
                 + bih_ref[...])
        return h_new

    h_last = lax.fori_loop(0, T, step, h0_ref[...])
    hf_ref[...] = h_last

    # Deferred i2o + log_softmax: one dense (T,H)@(H,OUT_PAD) matmul for all steps.
    logits = (jnp.dot(hist_ref[...], wio_h_ref[...],
                      preferred_element_type=jnp.float32)
              + xo_ref[...] + bio_ref[...])
    m = jnp.max(logits, axis=-1, keepdims=True)
    shifted = logits - m
    lse = jnp.log(jnp.sum(jnp.exp(shifted), axis=-1, keepdims=True))
    out_ref[...] = shifted - lse     # padded lanes stay finite (~ -1e30), sliced off outside


def prepare_params(w_i2h, b_i2h, w_i2o, b_i2o, input_size, hidden_size, output_size):
    """One-time weight preprocessing: transpose to (in_features, out_features),
    split the [input | hidden] rows, zero-pad the output lanes to OUT_PAD and
    set the padded bias lanes to -1e30 so log_softmax ignores them."""
    wih_t = jnp.asarray(w_i2h, jnp.float32).T                    # (IN+H, H)
    wio_t = jnp.asarray(w_i2o, jnp.float32).T                    # (IN+H, OUT)
    wih_x = wih_t[:input_size]                                   # (IN, H)
    wih_h = wih_t[input_size:]                                   # (H, H)
    wio_x = jnp.zeros((input_size, OUT_PAD), jnp.float32).at[:, :output_size].set(
        wio_t[:input_size])                                      # (IN, OUT_PAD)
    wio_h = jnp.zeros((hidden_size, OUT_PAD), jnp.float32).at[:, :output_size].set(
        wio_t[input_size:])                                      # (H, OUT_PAD)
    bih = jnp.asarray(b_i2h, jnp.float32).reshape(1, hidden_size)
    bio = jnp.full((1, OUT_PAD), NEG_BIG, jnp.float32).at[0, :output_size].set(
        jnp.asarray(b_i2o, jnp.float32))
    return wih_x, wih_h, bih, wio_x, wio_h, bio


@functools.partial(jax.jit, static_argnames=("output_size",))
def rnn_sequence_forward(letter_idx, h0, params, *, output_size):
    """Run the char-RNN over a whole sequence of letter indices in ONE kernel.

    letter_idx : (T,) int32 letter indices (the one-hot tensors of the module)
    h0         : (1, H) float32 initial hidden (initHidden())
    Returns (log_probs (T, 1, output_size), final hidden (1, H))."""
    wih_x, wih_h, bih, wio_x, wio_h, bio = params
    T = letter_idx.shape[0]
    H = h0.shape[1]

    # One-hot input => x_t @ W_x is a row gather of the weight; hoist it out of
    # the kernel so the in-kernel loads are dense, aligned (1, H) rows.
    xh_rows = jnp.take(wih_x, letter_idx, axis=0)      # (T, H)
    xo_rows = jnp.take(wio_x, letter_idx, axis=0)      # (T, OUT_PAD)

    out_padded, h_final = pl.pallas_call(
        rnn_seq_kernel,
        out_shape=(jax.ShapeDtypeStruct((T, OUT_PAD), jnp.float32),
                   jax.ShapeDtypeStruct((1, H), jnp.float32)),
        scratch_shapes=[pltpu.VMEM((T, H), jnp.float32)],   # previous-hidden history
    )(xh_rows, xo_rows, h0, wih_h, bih, wio_h, bio)

    # TODO(synk): for bulk inference, batch many (padded) names so the
    # recurrence matmul becomes (B, H) @ (H, H) and fills MXU rows.
    return out_padded[:, None, :output_size], h_final


if __name__ == "__main__":
    all_letters = string.ascii_letters + " .,;'"
    n_letters = len(all_letters)          # 57
    n_hidden = 128
    n_categories = 18                     # classic names-classification dataset

    key = jax.random.PRNGKey(0)
    k1, k2, k3, k4 = jax.random.split(key, 4)

    # Deterministic PyTorch-style Linear init: U(-1/sqrt(fan_in), 1/sqrt(fan_in))
    fan_in = n_letters + n_hidden
    bound = 1.0 / (fan_in ** 0.5)
    w_i2h = jax.random.uniform(k1, (n_hidden, fan_in), jnp.float32, -bound, bound)
    b_i2h = jax.random.uniform(k2, (n_hidden,), jnp.float32, -bound, bound)
    w_i2o = jax.random.uniform(k3, (n_categories, fan_in), jnp.float32, -bound, bound)
    b_i2o = jax.random.uniform(k4, (n_categories,), jnp.float32, -bound, bound)

    # One-time weight prep (transpose/split/pad) — off the per-sequence hot path.
    params = jax.block_until_ready(
        prepare_params(w_i2h, b_i2h, w_i2o, b_i2o, n_letters, n_hidden, n_categories))

    # line_to_tensor('Albert') reduced to letter indices (one-hot exploited via row gather).
    name = "Albert"
    letter_idx = jnp.array([all_letters.find(c) for c in name], jnp.int32)
    h0 = jnp.zeros((1, n_hidden), jnp.float32)            # initHidden()

    log_probs, h_final = rnn_sequence_forward(
        letter_idx, h0, params, output_size=n_categories)
    jax.block_until_ready((log_probs, h_final))

    # Pure-JAX reference of the PyTorch per-step forward, looped over the name.
    h = h0
    ref_outs = []
    for t in range(len(name)):
        x = jnp.zeros((1, n_letters), jnp.float32).at[0, int(letter_idx[t])].set(1.0)
        combined = jnp.concatenate([x, h], axis=1)
        h_next = combined @ w_i2h.T + b_i2h
        logits = combined @ w_i2o.T + b_i2o
        ref_outs.append(jax.nn.log_softmax(logits, axis=1))
        h = h_next
    ref_outs = jnp.stack(ref_outs, axis=0)                 # (T, 1, n_categories)

    assert log_probs.shape == (len(name), 1, n_categories)
    assert jnp.allclose(log_probs, ref_outs, atol=1e-4), "log_softmax mismatch"
    assert jnp.allclose(h_final, h, atol=1e-4), "hidden mismatch"

    print("KERNEL_OK")
</pallas_src>

<mosaic_0001>
module attributes {stable_mosaic.version = 11 : i64} {
  func.func @rnn_seq_kernel(%arg0: memref<6x128xf32, #tpu.memory_space<vmem>>, %arg1: memref<6x128xf32, #tpu.memory_space<vmem>>, %arg2: memref<1x128xf32, #tpu.memory_space<vmem>>, %arg3: memref<128x128xf32, #tpu.memory_space<vmem>>, %arg4: memref<1x128xf32, #tpu.memory_space<vmem>>, %arg5: memref<128x128xf32, #tpu.memory_space<vmem>>, %arg6: memref<1x128xf32, #tpu.memory_space<vmem>>, %arg7: memref<6x128xf32, #tpu.memory_space<vmem>>, %arg8: memref<1x128xf32, #tpu.memory_space<vmem>>, %arg9: memref<6x128xf32, #tpu.memory_space<vmem>>) attributes {dimension_semantics = [], scalar_prefetch = 0 : i64, scratch_operands = 1 : i64, tpu.core_type = #tpu.core_type<tc>} {
    %c0 = arith.constant 0 : index
    %c0_0 = arith.constant 0 : index
    %0 = vector.load %arg2[%c0, %c0_0] : memref<1x128xf32, #tpu.memory_space<vmem>>, vector<1x128xf32>
    %c0_i32 = arith.constant 0 : i32
    %c6_i32 = arith.constant 6 : i32
    %1 = arith.addi %c0_i32, %c6_i32 : i32
    %c1_i32 = arith.constant 1 : i32
    %2 = scf.for %arg10 = %c0_i32 to %1 step %c1_i32 iter_args(%arg11 = %0) -> (vector<1x128xf32>)  : i32 {
      %23 = arith.index_cast %arg10 : i32 to index
      %c0_16 = arith.constant 0 : index
      %24 = vector.load %arg9[%23, %c0_16] : memref<6x128xf32, #tpu.memory_space<vmem>>, vector<1x128xf32>
      tpu.vector_store %arg9[%23, %c0_16], %arg11 {strides = array<i32>} : memref<6x128xf32, #tpu.memory_space<vmem>>, vector<1x128xf32>,
      %25 = arith.index_cast %arg10 : i32 to index
      %c0_17 = arith.constant 0 : index
      %26 = vector.load %arg0[%25, %c0_17] : memref<6x128xf32, #tpu.memory_space<vmem>>, vector<1x128xf32>
      %c0_18 = arith.constant 0 : index
      %c0_19 = arith.constant 0 : index
      %27 = vector.load %arg3[%c0_18, %c0_19] : memref<128x128xf32, #tpu.memory_space<vmem>>, vector<128x128xf32>
      %cst_20 = arith.constant dense<0.000000e+00> : vector<1x128xf32>
      %28 = tpu.matmul %arg11, %27, %cst_20 {dimension_numbers = #tpu.dot_dimension_numbers<[1], [0], [0], [1], [0, 0, 1, 1], [], []>} : vector<1x128xf32>, vector<128x128xf32>, vector<1x128xf32> -> vector<1x128xf32>
      %29 = arith.addf %26, %28 : vector<1x128xf32>
      %c0_21 = arith.constant 0 : index
      %c0_22 = arith.constant 0 : index
      %30 = vector.load %arg4[%c0_21, %c0_22] : memref<1x128xf32, #tpu.memory_space<vmem>>, vector<1x128xf32>
      %31 = arith.addf %29, %30 : vector<1x128xf32>
      scf.yield %31 : vector<1x128xf32>
    }
    %c6_i32_1 = arith.constant 6 : i32
    %c0_2 = arith.constant 0 : index
    %c0_3 = arith.constant 0 : index
    %3 = vector.load %arg8[%c0_2, %c0_3] : memref<1x128xf32, #tpu.memory_space<vmem>>, vector<1x128xf32>
    tpu.vector_store %arg8[%c0_2, %c0_3], %2 {strides = array<i32>} : memref<1x128xf32, #tpu.memory_space<vmem>>, vector<1x128xf32>,
    %c0_4 = arith.constant 0 : index
    %c0_5 = arith.constant 0 : index
    %4 = vector.load %arg9[%c0_4, %c0_5] : memref<6x128xf32, #tpu.memory_space<vmem>>, vector<6x128xf32>
    %c0_6 = arith.constant 0 : index
    %c0_7 = arith.constant 0 : index
    %5 = vector.load %arg5[%c0_6, %c0_7] : memref<128x128xf32, #tpu.memory_space<vmem>>, vector<128x128xf32>
    %cst = arith.constant dense<0.000000e+00> : vector<6x128xf32>
    %6 = tpu.matmul %4, %5, %cst {dimension_numbers = #tpu.dot_dimension_numbers<[1], [0], [0], [1], [0, 0, 1, 1], [], []>} : vector<6x128xf32>, vector<128x128xf32>, vector<6x128xf32> -> vector<6x128xf32>
    %c0_8 = arith.constant 0 : index
    %c0_9 = arith.constant 0 : index
    %7 = vector.load %arg1[%c0_8, %c0_9] : memref<6x128xf32, #tpu.memory_space<vmem>>, vector<6x128xf32>
    %8 = arith.addf %6, %7 : vector<6x128xf32>
    %c0_10 = arith.constant 0 : index
    %c0_11 = arith.constant 0 : index
    %9 = vector.load %arg6[%c0_10, %c0_11] : memref<1x128xf32, #tpu.memory_space<vmem>>, vector<1x128xf32>
    %10 = vector.broadcast %9 : vector<1x128xf32> to vector<6x128xf32>
    %11 = arith.addf %8, %10 : vector<6x128xf32>
    %cst_12 = arith.constant dense<0xFF800000> : vector<6xf32>
    %12 = vector.multi_reduction <maximumf>, %11, %cst_12 [1] : vector<6x128xf32> to vector<6xf32>
    %13 = vector.shape_cast %12 : vector<6xf32> to vector<6x1xf32>
    %14 = vector.broadcast %13 : vector<6x1xf32> to vector<6x128xf32>
    %15 = arith.subf %11, %14 : vector<6x128xf32>
    %16 = math.exp %15 : vector<6x128xf32>
    %cst_13 = arith.constant dense<0.000000e+00> : vector<6xf32>
    %17 = vector.multi_reduction <add>, %16, %cst_13 [1] : vector<6x128xf32> to vector<6xf32>
    %18 = vector.shape_cast %17 : vector<6xf32> to vector<6x1xf32>
    %19 = math.log %18 : vector<6x1xf32>
    %20 = vector.broadcast %19 : vector<6x1xf32> to vector<6x128xf32>
    %21 = arith.subf %15, %20 : vector<6x128xf32>
    %c0_14 = arith.constant 0 : index
    %c0_15 = arith.constant 0 : index
    %22 = vector.load %arg7[%c0_14, %c0_15] : memref<6x128xf32, #tpu.memory_space<vmem>>, vector<6x128xf32>
    tpu.vector_store %arg7[%c0_14, %c0_15], %21 {strides = array<i32>} : memref<6x128xf32, #tpu.memory_space<vmem>>, vector<6x128xf32>,
    return
  }
}

</mosaic_0001>

<bundles_post_ra>
// kernel: rnn_sequence_forward.1
= control target key start
LH: loop header
LB: loop body
LE: loop exit
PB: predicated region body
PF: predicated region fallthrough
CT: control target
= control target key end

     0   :  { %14 = vsyncpa [#allocation4], 0  ;;  %s617_s0 = inlined_call_operand.vmem [shape: f32[6,128], index: 0, kind: input, shape index: {}]   ;;  %s618_s1 = inlined_call_operand.vmem [shape: f32[6,128], index: 1, kind: input, shape index: {}]   ;;  %s619_s2 = inlined_call_operand.vmem [shape: f32[1,128], index: 2, kind: input, shape index: {}]   ;;  %s620_s3 = inlined_call_operand.vmem [shape: f32[128,128], index: 3, kind: input, shape index: {}]   ;;  %s621_s4 = inlined_call_operand.vmem [shape: f32[1,128], index: 4, kind: input, shape index: {}]   ;;  %s622_s5 = inlined_call_operand.hbm [shape: f32[128,128], index: 5, kind: input, shape index: {}]   ;;  %s623_s6 = inlined_call_operand.vmem [shape: f32[1,128], index: 6, kind: input, shape index: {}]   ;;  %s624_s7 = inlined_call_operand.vmem [shape: f32[6,128], index: 7, kind: output, shape index: {0}]   ;;  %s625_s8 = inlined_call_operand.hbm [shape: f32[1,128], index: 8, kind: output, shape index: {1}]  }
   0x1   :  { %15 = vsyncpa [#allocation5], 0  ;;  %s477_s27 = smov [#allocation3]  }
   0x2   :  { %s31_s28 = sshll.u32 %s477_s27, 4  ;;  %s32_s28 = int_to_ptr.vmem [resolvable:$true] %s31_s28 }
   0x3   :  { %s425_s29 = scalar_lea.vmem %s32_s28, 2048  ;;  %p430_p1 = scmp.lt.s32.totalorder %s32_s28, %s32_s28 }
   0x4   :  { %p426_p0 = scmp.ne.s32.totalorder %s32_s28, %s425_s29  ;;  %p431_p2 = scmp.lt.s32.totalorder %s425_s29, %s425_s29 }
   0x6   :  { %p432_p3 = por %p431_p2, %p430_p1 }
   0x8   :  { %p433_p4 = pnand %p432_p3, %p426_p0 }
   0xa   :  { %436 = shalt.err (!%p433_p4)
}
   0xb   :  { %s478_s30 = smov 128   ;;  %s479_s9 = smov 8  }
   0xc   :  { %37 = dma.hbm_to_vmem [thread:$0]  %s622_s5, 2048, %s32_s28, [#allocation4], %s478_s30, %s478_s30, %s479_s9  }
   0xd   :  { %465 = dma.done.wait [#allocation4], 2048  }
   0xe   :  { %466 = vsyncadd [#allocation4], 4294965248  ;;  %v43_v0 = vld [vmem:[%s619_s2] sm:$0x1]   ;;  %s538_s14 = smov 0  }
   0xf LB: > { %v70_v1 = vld [vmem:[%s620_s3 + $0x78] sm:$0xff]  ;;  %v480_v2 = vmov 0.0   ;;  %v69_v3 = vld [vmem:[%s620_s3 + $0x70] sm:$0xff]  ;;  %vm481_vm0 = vmmov 0   ;;  %v68_v4 = vld [vmem:[%s620_s3 + $0x68] sm:$0xff]  ;;  %s51_s19 = scalar_lea.vmem [#allocation2], %s475_s14  ;;  %s53_s25 = scalar_lea.vmem %s617_s0, %s475_s14  ;;  %s475_s14 = sphi %s538_s14, %s49_s14   ;;  %v471_v0 = vphi %v43_v0, %v626_v0  }
  0x10   : > { %319 = vmatprep.subr.mxu0 %v480_v2  ;;  %351 = vmatprep.mubr.msk.f32.mxu0 %vm481_vm0, %v480_v2  ;;  %52 = vst [vmem:[%s51_s19] sm:$0x1] %v471_v0  ;;  %v67_v5 = vld [vmem:[%s620_s3 + $0x60] sm:$0xff]  ;;  %v66_v6 = vld [vmem:[%s620_s3 + $0x58] sm:$0xff]  ;;  %v65_v7 = vld [vmem:[%s620_s3 + $0x50] sm:$0xff]  ;;  %s49_s14 = sadd.s32 1, %s475_s14  }
  0x11   : > { %320 = vmatpush3.msra.mxu0 %v70_v1  ;;  %v64_v8 = vld [vmem:[%s620_s3 + $0x48] sm:$0xff]  ;;  %v63_v9 = vld [vmem:[%s620_s3 + $0x40] sm:$0xff]  ;;  %v62_v10 = vld [vmem:[%s620_s3 + $0x38] sm:$0xff]  ;;  %p46_p5 = scmp.ge.s32.totalorder %s49_s14, 6  }
  0x12   : > { %321 = vmatprep.subr.mxu0 %v480_v2  ;;  %v61_v11 = vld [vmem:[%s620_s3 + $0x30] sm:$0xff]  ;;  %v60_v12 = vld [vmem:[%s620_s3 + $0x28] sm:$0xff]  ;;  %v59_v13 = vld [vmem:[%s620_s3 + $0x20] sm:$0xff]  ;;  %v482_v25 = vmov (%p46_p5), 0.0   ;;  %vm483_vm1 = vmmov (%p46_p5), 0   ;;  %vm241_vm2 = vcmask (%p46_p5), 1045504  }
  0x13   : > { %322 = vmatpush3.msra.mxu0 %v69_v3  ;;  %v58_v14 = vld [vmem:[%s620_s3 + $0x18] sm:$0xff]  ;;  %v57_v15 = vld [vmem:[%s620_s3 + $0x10] sm:$0xff]  ;;  %v56_v16 = vld [vmem:[%s620_s3 + $0x8] sm:$0xff]  ;;  %s484_s28 = smov (%p46_p5), [#allocation6]  }
  0x14   : > { %323 = vmatprep.subr.mxu0 %v480_v2  ;;  %v55_v17 = vld [vmem:[%s620_s3] sm:$0xff]  ;;  %v160_v26 = vld [vmem:[#allocation3 + $0x70] sm:$0xff] (%p46_p5)  ;;  %v159_v27 = vld [vmem:[#allocation3 + $0x68] sm:$0xff] (%p46_p5) }
  0x15   : > { %324 = vmatpush3.msra.mxu0 %v68_v4  ;;  %v54_v18 = vld [vmem:[%s53_s25] sm:$0x1]  ;;  %v158_v28 = vld [vmem:[#allocation3 + $0x60] sm:$0xff] (%p46_p5)  ;;  %v156_v30 = vld [vmem:[#allocation3 + $0x50] sm:$0xff] (%p46_p5) }
  0x16   : > { %325 = vmatprep.subr.mxu0 %v480_v2  ;;  %v142_v20 = vld [vmem:[%s621_s4] sm:$0x1]  ;;  %v155_v31 = vld [vmem:[#allocation3 + $0x48] sm:$0xff] (%p46_p5)  ;;  %v154_v32 = vld [vmem:[#allocation3 + $0x40] sm:$0xff] (%p46_p5) }
  0x17   : > { %326 = vmatpush3.msra.mxu0 %v67_v5  ;;  %v161_v24 = vld [vmem:[#allocation3 + $0x78] sm:$0xff] (%p46_p5)  ;;  %v152_v34 = vld [vmem:[#allocation3 + $0x30] sm:$0xff] (%p46_p5)  ;;  %v151_v35 = vld [vmem:[#allocation3 + $0x28] sm:$0xff] (%p46_p5) }
  0x18   : > { %327 = vmatprep.subr.mxu0 %v480_v2  ;;  %v157_v29 = vld [vmem:[#allocation3 + $0x58] sm:$0xff] (%p46_p5)  ;;  %v150_v36 = vld [vmem:[#allocation3 + $0x20] sm:$0xff] (%p46_p5)  ;;  %v148_v38 = vld [vmem:[#allocation3 + $0x10] sm:$0xff] (%p46_p5) }
  0x19   : > { %328 = vmatpush3.msra.mxu0 %v66_v6  ;;  %v153_v33 = vld [vmem:[#allocation3 + $0x38] sm:$0xff] (%p46_p5)  ;;  %v147_v39 = vld [vmem:[#allocation3 + $0x8] sm:$0xff] (%p46_p5)  ;;  %v146_v40 = vld [vmem:[#allocation3] sm:$0xff] (%p46_p5) }
  0x1a   : > { %329 = vmatprep.subr.mxu0 %v480_v2  ;;  %v149_v37 = vld [vmem:[#allocation3 + $0x18] sm:$0xff] (%p46_p5) }
  0x1b   : > { %330 = vmatpush3.msra.mxu0 %v65_v7  ;;  %v145_v41 = vld [vmem:[#allocation2] sm:$0x3f] (%p46_p5) }
  0x1c   : > { %331 = vmatprep.subr.mxu0 %v480_v2  ;;  %v162_v42 = vld [vmem:[%s618_s1] sm:$0x3f] (%p46_p5)  ;;  %s263_s1 = sshll.u32 (%p46_p5), %s484_s28, 4  ;;  %s264_s1 = int_to_ptr.vmem [resolvable:$true] %s263_s1 }
  0x1d   : > { %332 = vmatpush3.msra.mxu0 %v64_v8  ;;  %v284_v44 = vld [vmem:[%s623_s6] ss:$0 sm:$0xff] (%p46_p5)  ;;  %s437_s29 = scalar_lea.vmem (%p46_p5), %s264_s1, 16  ;;  %s441_s30 = scalar_lea.vmem (%p46_p5), %s264_s1, 32 }
  0x1e   : > { %333 = vmatprep.subr.mxu0 %v480_v2  ;;  %p438_p6 = scmp.ne.s32.totalorder (%p46_p5), %s264_s1, %s437_s29  ;;  %p442_p7 = scmp.lt.s32.totalorder (%p46_p5), %s264_s1, %s264_s1 }
  0x1f   : > { %334 = vmatpush3.msra.mxu0 %v63_v9  ;;  %p443_p8 = scmp.lt.s32.totalorder (%p46_p5), %s441_s30, %s437_s29 }
  0x20   : > { %335 = vmatprep.subr.mxu0 %v480_v2 }
  0x21   : > { %336 = vmatpush3.msra.mxu0 %v62_v10  ;;  %p444_p9 = por (%p46_p5), %p443_p8, %p442_p7 }
  0x22   : > { %337 = vmatprep.subr.mxu0 %v480_v2 }
  0x23   : > { %338 = vmatpush3.msra.mxu0 %v61_v11  ;;  %p445_p10 = pnand (%p46_p5), %p444_p9, %p438_p6 }
  0x24   : > { %339 = vmatprep.subr.mxu0 %v480_v2 }
  0x25   : > { %340 = vmatpush3.msra.mxu0 %v60_v12 }
  0x26   : > { %341 = vmatprep.subr.mxu0 %v480_v2 }
  0x27   : > { %342 = vmatpush3.msra.mxu0 %v59_v13 }
  0x28   : > { %343 = vmatprep.subr.mxu0 %v480_v2 }
  0x29   : > { %344 = vmatpush3.msra.mxu0 %v58_v14 }
  0x2a   : > { %345 = vmatprep.subr.mxu0 %v480_v2 }
  0x2b   : > { %346 = vmatpush3.msra.mxu0 %v57_v15 }
  0x2c   : > { %347 = vmatprep.subr.mxu0 %v480_v2 }
  0x2d   : > { %348 = vmatpush3.msra.mxu0 %v56_v16 }
  0x2e   : > { %349 = vmatprep.subr.mxu0 %v480_v2 }
  0x2f   : > { %350 = vmatpush3.msra.mxu0 %v55_v17 }
  0x30   : > { %352 = vmatmul.mubr.f32.vlgmr.msra.gmra.mxu0 %v471_v0  ;;  %354 = vmatprep.subr.mxu0 (%p46_p5), %v482_v25 }
  0x31   :  { %386 = vmatprep.mubr.msk.f32.mxu0 (%p46_p5), %vm483_vm1, %v482_v25  ;;  %355 = vmatpush3.msra.mxu0 (%p46_p5), %v161_v24 }
  0x32   :  { %356 = vmatprep.subr.mxu0 (%p46_p5), %v482_v25 }
  0x33   :  { %357 = vmatpush3.msra.mxu0 (%p46_p5), %v160_v26 }
  0x34   :  { %358 = vmatprep.subr.mxu0 (%p46_p5), %v482_v25 }
  0x35   :  { %359 = vmatpush3.msra.mxu0 (%p46_p5), %v159_v27 }
  0x36   :  { %360 = vmatprep.subr.mxu0 (%p46_p5), %v482_v25 }
  0x37   :  { %361 = vmatpush3.msra.mxu0 (%p46_p5), %v158_v28 }
  0x38   :  { %362 = vmatprep.subr.mxu0 (%p46_p5), %v482_v25 }
  0x39   :  { %363 = vmatpush3.msra.mxu0 (%p46_p5), %v157_v29 }
  0x3a   :  { %364 = vmatprep.subr.mxu0 (%p46_p5), %v482_v25 }
  0x3b   :  { %365 = vmatpush3.msra.mxu0 (%p46_p5), %v156_v30 }
  0x3c   :  { %366 = vmatprep.subr.mxu0 (%p46_p5), %v482_v25 }
  0x3d   :  { %367 = vmatpush3.msra.mxu0 (%p46_p5), %v155_v31 }
  0x3e   :  { %368 = vmatprep.subr.mxu0 (%p46_p5), %v482_v25 }
  0x3f   :  { %369 = vmatpush3.msra.mxu0 (%p46_p5), %v154_v32 }
  0x40   :  { %370 = vmatprep.subr.mxu0 (%p46_p5), %v482_v25 }
  0x41   :  { %371 = vmatpush3.msra.mxu0 (%p46_p5), %v153_v33 }
  0x42   :  { %372 = vmatprep.subr.mxu0 (%p46_p5), %v482_v25 }
  0x43   :  { %373 = vmatpush3.msra.mxu0 (%p46_p5), %v152_v34 }
  0x44   :  { %374 = vmatprep.subr.mxu0 (%p46_p5), %v482_v25 }
  0x45   :  { %375 = vmatpush3.msra.mxu0 (%p46_p5), %v151_v35 }
  0x46   :  { %376 = vmatprep.subr.mxu0 (%p46_p5), %v482_v25 }
  0x47   :  { %377 = vmatpush3.msra.mxu0 (%p46_p5), %v150_v36 }
  0x48   :  { %378 = vmatprep.subr.mxu0 (%p46_p5), %v482_v25 }
  0x49   :  { %379 = vmatpush3.msra.mxu0 (%p46_p5), %v149_v37 }
  0x4a   :  { %380 = vmatprep.subr.mxu0 (%p46_p5), %v482_v25 }
  0x4b   :  { %381 = vmatpush3.msra.mxu0 (%p46_p5), %v148_v38 }
  0x4c   :  { %382 = vmatprep.subr.mxu0 (%p46_p5), %v482_v25 }
  0x4d   :  { %383 = vmatpush3.msra.mxu0 (%p46_p5), %v147_v39 }
  0x4e   :  { %384 = vmatprep.subr.mxu0 (%p46_p5), %v482_v25 }
  0x4f   :  { %385 = vmatpush3.msra.mxu0 (%p46_p5), %v146_v40 }
  0x50   :  { %387 = vmatmul.mubr.f32.vlgmr.msra.gmra.mxu0 (%p46_p5), %v145_v41 }
  0xf0   : > { %v137_v19 = vpop.f32.mrf.mxu0 }
  0xf1   : > { %v141_v21 = vadd.f32 %v137_v19, %v54_v18  ;;  %48 = sbr.rel (!%p46_p5) target bundleno = 15 (0xf), region = 69 }
  0xf2   : > { %v353_v22 = vpop.f32.mrf.mxu0 }
  0xf3   : > { %v143_v23 = vadd.f32 %v142_v20, %v141_v21  }
  0xf5   : > { %v626_v0 = vmov %v143_v23  ;;  %144 = vst [vmem:[#allocation6] sm:$0x1] (%p46_p5), %v143_v23 }
 0x110   :  { %v229_v43 = vpop.f32.mrf.mxu0 }
 0x111   :  { %v230_v45 = vadd.f32 %v229_v43, %v162_v42 }
 0x112   :  { %v388_v46 = vpop.f32.mrf.mxu0 }
 0x113   :  { %v240_v47 = vadd.f32 %v284_v44, %v230_v45 }
 0x115   :  { %v242_v48 = vsel %vm241_vm2, %v240_v47, -inf }
 0x116   :  { %243 = vmax.xlane.f32.xlu0 %v242_v48 }
 0x19f   :  { %v244_v49 = vpop.xlane.xlu0 %243 }
 0x1a0   :  { %v245_v50 = vsub.f32 %v240_v47, %v244_v49 }
 0x1a2   :  { %v246_v51 = vmul.f32 1.442695, %v245_v50 }
 0x1a4   :  { %413 = vpow2.f32 %v246_v51 }
 0x1b1   :  { %v414_v52 = vpop.eup %413 }
 0x1b2   :  { %v248_v53 = vsel %vm241_vm2, %v414_v52, 0.0 }
 0x1b3   :  { %249 = vadd.xlane.f32.xlu0 %v248_v53 }
 0x1b4   :  { %448 = shalt.err (!%p445_p10)
}
 0x1b5   :  { %266 = dma.vmem_to_hbm [thread:$0]  %s264_s1, 16, %s625_s8, [#allocation5]  }
 0x23c   :  { %v250_v54 = vpop.xlane.xlu0 %249 }
 0x23d   :  { %415 = vlog2.f32 %v250_v54 }
 0x24a   :  { %v416_v55 = vpop.eup %415 }
 0x24b   :  { %v252_v56 = vmul.f32 0.6931472, %v416_v55 }
 0x24d   :  { %v253_v57 = vsub.f32 %v245_v50, %v252_v56 }
 0x24f   :  { %254 = vst [vmem:[%s624_s7] sm:$0x3f] %v253_v57 }
 0x250   :  { %467 = dma.done.wait [#allocation5], 16  }
 0x251   :  { %468 = vsyncadd [#allocation5], 4294967280 }
 0x252   :  { %272 = vsyncpa [#allocation4], 1 }
 0x253   :  { %273 = vsyncpa [#allocation5], 1 }

</bundles_post_ra>
